<compile_context>
chip_gen: v5e
topology: v5e:2x2
jax: 0.10.0
libtpu: 0.0.40
codegen_flags: <defaults>
</compile_context>

<pallas_src>
import functools
import math

import jax
import jax.numpy as jnp
from jax.experimental import pallas as pl
from jax.experimental.pallas import tpu as pltpu


def _gat_kernel(h_ref, adj_ref, w_ref, a_ref, hprime_ref, att_ref, *,
                alpha, flatten_outputs):
    """One grid step = one block of Bb batch elements, fully resident in VMEM."""
    Bb, N, F_in = h_ref.shape
    F_out = w_ref.shape[1]

    # Wh: one tall (Bb*N, F_in) @ (F_in, F_out) MXU pass (sublane-filled,
    # tile-aligned merge for N a multiple of 8).
    h_flat = h_ref[...].reshape(Bb * N, F_in)
    Wh_flat = jnp.dot(h_flat, w_ref[...],
                      preferred_element_type=jnp.float32)      # (Bb*N, F_out)
    Wh = Wh_flat.reshape(Bb, N, F_out)                         # (Bb, N, F_out)

    ar = a_ref[...]                                            # (2, F_out): row0=a1, row1=a2

    # f1[b,i] = Wh[b,i] . a1 — single 2D trans-B dot, no broadcast.
    f1 = jnp.einsum('no,ko->nk', Wh_flat, ar[0:1, :],
                    preferred_element_type=jnp.float32).reshape(Bb, N, 1)

    # f2[b,j] = Wh[b,j] . a2 — batched trans-B contraction so the result
    # lands lane-major as (Bb, 1, N) with no XLU transpose.  Only a tiny
    # Bb*F_out broadcast of the a2 row remains.
    a2b = jnp.broadcast_to(ar[1:2, :][None], (Bb, 1, F_out))
    f2 = jnp.einsum('bko,bno->bkn', a2b, Wh,
                    preferred_element_type=jnp.float32)        # (Bb, 1, N)

    # e[b,i,j] = LeakyReLU_alpha(f1[b,i] + f2[b,j]), masked by adjacency.
    e = f1 + f2                                                # (Bb, N, N)
    e = jnp.where(e > 0, e, jnp.float32(alpha) * e)
    e = jnp.where(adj_ref[...] > 0, e, jnp.float32(-9e15))     # integer compare

    # Row softmax with exact division (denominator is only (Bb, N, 1) elems).
    m = jnp.max(e, axis=-1, keepdims=True)
    p = jnp.exp(e - m)
    att = p / jnp.sum(p, axis=-1, keepdims=True)

    # TODO(synk): F.dropout on attention skipped (eval-mode forward).

    # h_prime = attention @ Wh, then F.leaky_relu (default slope 0.01).
    hp = jnp.einsum('bij,bjo->bio', att, Wh,
                    preferred_element_type=jnp.float32)        # (Bb, N, F_out)
    hp = jnp.where(hp > 0, hp, jnp.float32(0.01) * hp)

    if flatten_outputs:
        # Lane-dense stores: one (1, N*F_out) / (1, N*N) row per batch element.
        hprime_ref[...] = hp.reshape(hprime_ref.shape).astype(hprime_ref.dtype)
        att_ref[...] = att.reshape(att_ref.shape).astype(att_ref.dtype)
    else:
        hprime_ref[...] = hp.astype(hprime_ref.dtype)
        att_ref[...] = att.astype(att_ref.dtype)


def _vmem_caps():
    """(physical VMEM bytes, scoped-VMEM cap to request) for this TPU generation."""
    phys = 128 * 1024 * 1024
    try:
        phys = int(getattr(pltpu.get_tpu_info(), "vmem_capacity_bytes", phys))
    except Exception:
        pass
    if phys <= 64 * 1024 * 1024:
        cap = 48 * 1024 * 1024        # v7x: 64 MiB physical -> leave headroom
    else:
        cap = 100 * 1024 * 1024       # v5e / v6e: 128 MiB physical
    return phys, cap


def _block_footprint_bytes(Bb, N, F_in, F_out, adj_bytes):
    """VMEM bytes for one grid step (pipelined blocks double-buffered;
    constant-index W / a operands are resident, counted once)."""
    f32 = 4
    pipelined = (Bb * N * F_in * f32          # h block
                 + Bb * N * N * adj_bytes     # adj block
                 + Bb * N * F_out * f32       # h_prime block
                 + Bb * N * N * f32)          # attention block
    resident = F_in * F_out * f32 + 2 * F_out * f32   # W, a rows
    temps = (Bb * N * F_out * f32             # Wh
             + 4 * Bb * N * N * f32)          # e / p / att / mask intermediates
    return 2 * pipelined + resident + temps


def _pick_block_batch(B, N, F_in, F_out, adj_bytes, budget_bytes):
    """Largest divisor of B whose block fits the budget, preferring >= 2 grid
    steps so the 'parallel' batch axis can shard across v7x's two TCs."""
    divisors = [d for d in range(1, B + 1) if B % d == 0]
    fits = [d for d in divisors
            if _block_footprint_bytes(d, N, F_in, F_out, adj_bytes) <= budget_bytes]
    if not fits:
        return 1
    multi = [d for d in fits if d <= B // 2] if B >= 2 else fits
    return max(multi) if multi else max(fits)


def gat_layer(h, adj, W, a, alpha):
    B, N, F_in = h.shape
    F_out = W.shape[1]

    # Wrapper-side layout plumbing (free):
    #   * `a` (2*F_out, 1) -> (2, F_out): row 0 = a1, row 1 = a2 (lane-major).
    #   * adjacency: int32 at small N; int8 only when the N^2 DMA matters.
    a_rows = a.reshape(2, F_out)
    use_int8 = N >= 128
    adj_dtype = jnp.int8 if use_int8 else jnp.int32
    adj_k = adj if adj.dtype == adj_dtype else (adj > 0).astype(adj_dtype)
    adj_bytes = 1 if use_int8 else 4

    _, vmem_cap = _vmem_caps()
    Bb = _pick_block_batch(B, N, F_in, F_out, adj_bytes, vmem_cap)
    footprint = _block_footprint_bytes(Bb, N, F_in, F_out, adj_bytes)
    vmem_limit = int(min(vmem_cap,
                         max(32 * 1024 * 1024, footprint + 8 * 1024 * 1024)))
    grid = (B // Bb,)

    # Advisory cost hint so XLA overlaps this small call with neighboring ops.
    cost = pl.CostEstimate(
        flops=int(2 * B * N * F_in * F_out          # h @ W
                  + 4 * B * N * F_out               # f1 / f2 projections
                  + 2 * B * N * N * F_out           # attention @ Wh
                  + 10 * B * N * N),                # leaky-relu / mask / softmax VPU work
        transcendentals=int(B * N * N),             # exp
        bytes_accessed=int(4 * B * N * F_in + adj_bytes * B * N * N
                           + 4 * F_in * F_out + 8 * F_out
                           + 4 * B * N * F_out + 4 * B * N * N))

    def _build(flatten_outputs):
        kernel = functools.partial(_gat_kernel, alpha=float(alpha),
                                   flatten_outputs=flatten_outputs)
        if flatten_outputs:
            out_shape = (jax.ShapeDtypeStruct((B, 1, N * F_out), jnp.float32),
                         jax.ShapeDtypeStruct((B, 1, N * N), jnp.float32))
            out_specs = [pl.BlockSpec((Bb, 1, N * F_out), lambda b: (b, 0, 0)),
                         pl.BlockSpec((Bb, 1, N * N), lambda b: (b, 0, 0))]
        else:
            out_shape = (jax.ShapeDtypeStruct((B, N, F_out), jnp.float32),
                         jax.ShapeDtypeStruct((B, N, N), jnp.float32))
            out_specs = [pl.BlockSpec((Bb, N, F_out), lambda b: (b, 0, 0)),
                         pl.BlockSpec((Bb, N, N), lambda b: (b, 0, 0))]
        grid_spec = pltpu.PrefetchScalarGridSpec(
            num_scalar_prefetch=0,
            grid=grid,
            in_specs=[
                pl.BlockSpec((Bb, N, F_in), lambda b: (b, 0, 0)),   # h
                pl.BlockSpec((Bb, N, N), lambda b: (b, 0, 0)),      # adj
                pl.BlockSpec((F_in, F_out), lambda b: (0, 0)),      # W (resident)
                pl.BlockSpec((2, F_out), lambda b: (0, 0)),         # a rows (resident)
            ],
            out_specs=out_specs)
        return pl.pallas_call(
            kernel,
            out_shape=out_shape,
            grid_spec=grid_spec,
            cost_estimate=cost,
            compiler_params=pltpu.CompilerParams(
                dimension_semantics=("parallel",),
                vmem_limit_bytes=vmem_limit))

    try:
        hp_flat, att_flat = _build(True)(h, adj_k, W, a_rows)
        return hp_flat.reshape(B, N, F_out), att_flat.reshape(B, N, N)
    except Exception:
        # Fallback: if this Mosaic version rejects the in-kernel lane-dense
        # flatten reshape, use the previously-validated 3D store path.
        return _build(False)(h, adj_k, W, a_rows)


def _xavier_uniform(key, shape, gain):
    fan_in, fan_out = shape[0], shape[1]
    bound = gain * math.sqrt(6.0 / (fan_in + fan_out))
    return jax.random.uniform(key, shape, jnp.float32, -bound, bound)


def _reference(h, adj, W, a, alpha):
    # Pure-JAX mirror of the PyTorch GraphAttentionLayer forward (eval mode).
    F_out = W.shape[1]
    Wh = jnp.einsum('bnf,fo->bno', h, W)
    f1 = Wh @ a[:F_out, :]              # (B, N, 1)
    f2 = Wh @ a[F_out:, :]              # (B, N, 1)
    e = f1 + jnp.swapaxes(f2, 1, 2)
    e = jnp.where(e > 0, e, alpha * e)
    e = jnp.where(adj > 0, e, -9e15)
    att = jax.nn.softmax(e, axis=2)
    hp = jnp.einsum('bij,bjo->bio', att, Wh)
    hp = jnp.where(hp > 0, hp, 0.01 * hp)
    return hp, att


if __name__ == "__main__":
    # Shapes implied by GraphSelfAttention: nhid=32, nheads=2 -> GAT(32 -> 16),
    # batch=2 graphs of 8 nodes.  alpha defaults to 0.1 in the module.
    B, N, F_in, F_out = 2, 8, 32, 16
    alpha = 0.1

    key = jax.random.PRNGKey(0)
    k_h, k_adj, k_w, k_a = jax.random.split(key, 4)

    h = jax.random.normal(k_h, (B, N, F_in), jnp.float32)
    # Random 0/1 adjacency with self-loops so every row has a valid neighbor.
    adj = (jax.random.uniform(k_adj, (B, N, N)) > 0.5).astype(jnp.int32)
    adj = jnp.maximum(adj, jnp.eye(N, dtype=jnp.int32)[None])

    W = _xavier_uniform(k_w, (F_in, F_out), gain=1.414)
    a = _xavier_uniform(k_a, (2 * F_out, 1), gain=1.414)

    h_prime, attention = gat_layer(h, adj, W, a, alpha)
    jax.block_until_ready((h_prime, attention))

    hp_ref, att_ref = _reference(h, adj, W, a, alpha)
    assert jnp.allclose(h_prime, hp_ref, atol=1e-4, rtol=1e-4)
    assert jnp.allclose(attention, att_ref, atol=1e-4, rtol=1e-4)

    # TODO(synk): the surrounding GraphSelfAttention glue (multi-head concat,
    # Norm, Linear, nn.MultiheadAttention) is standard dense ops left to XLA.
    print("KERNEL_OK")
</pallas_src>

<mosaic_0001>
module attributes {stable_mosaic.version = 11 : i64} {
  func.func @_gat_kernel(%arg0: i32, %arg1: memref<1x8x32xf32, #tpu.memory_space<vmem>>, %arg2: memref<1x8x8xi32, #tpu.memory_space<vmem>>, %arg3: memref<32x16xf32, #tpu.memory_space<vmem>>, %arg4: memref<2x16xf32, #tpu.memory_space<vmem>>, %arg5: memref<1x1x128xf32, #tpu.memory_space<vmem>>, %arg6: memref<1x1x64xf32, #tpu.memory_space<vmem>>) attributes {dimension_semantics = [#tpu.dimension_semantics<parallel>], iteration_bounds = array<i64: 2>, scalar_prefetch = 0 : i64, scratch_operands = 0 : i64, tpu.core_type = #tpu.core_type<tc>, window_params = [{transform_indices = @transform_0, window_bounds = array<i64: 1, 8, 32>}, {transform_indices = @transform_1, window_bounds = array<i64: 1, 8, 8>}, {pipeline_mode = #tpu.pipeline_mode<synchronous>, transform_indices = @transform_2, window_bounds = array<i64: 32, 16>}, {pipeline_mode = #tpu.pipeline_mode<synchronous>, transform_indices = @transform_3, window_bounds = array<i64: 2, 16>}, {transform_indices = @transform_4, window_bounds = array<i64: 1, 1, 128>}, {transform_indices = @transform_5, window_bounds = array<i64: 1, 1, 64>}]} {
    %c0 = arith.constant 0 : index
    %c0_0 = arith.constant 0 : index
    %c0_1 = arith.constant 0 : index
    %0 = vector.load %arg1[%c0, %c0_0, %c0_1] : memref<1x8x32xf32, #tpu.memory_space<vmem>>, vector<1x8x32xf32>
    %1 = vector.shape_cast %0 : vector<1x8x32xf32> to vector<8x32xf32>
    %c0_2 = arith.constant 0 : index
    %c0_3 = arith.constant 0 : index
    %2 = vector.load %arg3[%c0_2, %c0_3] : memref<32x16xf32, #tpu.memory_space<vmem>>, vector<32x16xf32>
    %cst = arith.constant dense<0.000000e+00> : vector<8x16xf32>
    %3 = tpu.matmul %1, %2, %cst {dimension_numbers = #tpu.dot_dimension_numbers<[1], [0], [0], [1], [0, 0, 1, 1], [], []>} : vector<8x32xf32>, vector<32x16xf32>, vector<8x16xf32> -> vector<8x16xf32>
    %4 = vector.shape_cast %3 : vector<8x16xf32> to vector<1x8x16xf32>
    %c0_4 = arith.constant 0 : index
    %c0_5 = arith.constant 0 : index
    %5 = vector.load %arg4[%c0_4, %c0_5] : memref<2x16xf32, #tpu.memory_space<vmem>>, vector<2x16xf32>
    %6 = vector.extract_strided_slice %5 {offsets = [0, 0], sizes = [1, 16], strides = [1, 1]} : vector<2x16xf32> to vector<1x16xf32>
    "tpu.trace_start"() <{level = 10 : i32, message = "no,ko->nk"}> : () -> ()
    %cst_6 = arith.constant dense<0.000000e+00> : vector<8x1xf32>
    %7 = tpu.matmul %3, %6, %cst_6 {dimension_numbers = #tpu.dot_dimension_numbers<[1], [1], [0], [0], [0, 0, 1, 0], [], []>} : vector<8x16xf32>, vector<1x16xf32>, vector<8x1xf32> -> vector<8x1xf32>
    "tpu.trace_stop"() : () -> ()
    %8 = vector.shape_cast %7 : vector<8x1xf32> to vector<1x8x1xf32>
    %9 = vector.extract_strided_slice %5 {offsets = [1, 0], sizes = [1, 16], strides = [1, 1]} : vector<2x16xf32> to vector<1x16xf32>
    %10 = vector.shape_cast %9 : vector<1x16xf32> to vector<1x1x16xf32>
    "tpu.trace_start"() <{level = 10 : i32, message = "bko,bno->bkn"}> : () -> ()
    %cst_7 = arith.constant dense<0.000000e+00> : vector<1x1x8xf32>
    %11 = tpu.matmul %10, %4, %cst_7 {dimension_numbers = #tpu.dot_dimension_numbers<[2], [2], [1], [1], [0, 0, 0, 1, 1, 1], [0], [0]>} : vector<1x1x16xf32>, vector<1x8x16xf32>, vector<1x1x8xf32> -> vector<1x1x8xf32>
    "tpu.trace_stop"() : () -> ()
    %12 = vector.broadcast %8 : vector<1x8x1xf32> to vector<1x8x8xf32>
    %13 = vector.broadcast %11 : vector<1x1x8xf32> to vector<1x8x8xf32>
    %14 = arith.addf %12, %13 : vector<1x8x8xf32>
    %cst_8 = arith.constant 0.000000e+00 : f32
    %15 = vector.broadcast %cst_8 : f32 to vector<1x8x8xf32>
    %16 = arith.cmpf ogt, %14, %15 : vector<1x8x8xf32>
    %cst_9 = arith.constant 1.000000e-01 : f32
    %17 = vector.broadcast %cst_9 : f32 to vector<1x8x8xf32>
    %18 = arith.mulf %17, %14 : vector<1x8x8xf32>
    %19 = arith.select %16, %14, %18 : vector<1x8x8xi1>, vector<1x8x8xf32>
    %c0_10 = arith.constant 0 : index
    %c0_11 = arith.constant 0 : index
    %c0_12 = arith.constant 0 : index
    %20 = vector.load %arg2[%c0_10, %c0_11, %c0_12] : memref<1x8x8xi32, #tpu.memory_space<vmem>>, vector<1x8x8xi32>
    %c0_i32 = arith.constant 0 : i32
    %21 = vector.broadcast %c0_i32 : i32 to vector<1x8x8xi32>
    %22 = arith.cmpi sgt, %20, %21 : vector<1x8x8xi32>
    %cst_13 = arith.constant -9.000000e+15 : f32
    %23 = vector.broadcast %cst_13 : f32 to vector<1x8x8xf32>
    %24 = arith.select %22, %19, %23 : vector<1x8x8xi1>, vector<1x8x8xf32>
    %cst_14 = arith.constant dense<0xFF800000> : vector<1x8xf32>
    %25 = vector.multi_reduction <maximumf>, %24, %cst_14 [2] : vector<1x8x8xf32> to vector<1x8xf32>
    %26 = vector.shape_cast %25 : vector<1x8xf32> to vector<1x8x1xf32>
    %27 = vector.broadcast %26 : vector<1x8x1xf32> to vector<1x8x8xf32>
    %28 = arith.subf %24, %27 : vector<1x8x8xf32>
    %29 = math.exp %28 : vector<1x8x8xf32>
    %cst_15 = arith.constant dense<0.000000e+00> : vector<1x8xf32>
    %30 = vector.multi_reduction <add>, %29, %cst_15 [2] : vector<1x8x8xf32> to vector<1x8xf32>
    %31 = vector.shape_cast %30 : vector<1x8xf32> to vector<1x8x1xf32>
    %32 = vector.broadcast %31 : vector<1x8x1xf32> to vector<1x8x8xf32>
    %33 = arith.divf %29, %32 : vector<1x8x8xf32>
    "tpu.trace_start"() <{level = 10 : i32, message = "bij,bjo->bio"}> : () -> ()
    %cst_16 = arith.constant dense<0.000000e+00> : vector<1x8x16xf32>
    %34 = tpu.matmul %33, %4, %cst_16 {dimension_numbers = #tpu.dot_dimension_numbers<[2], [1], [1], [2], [0, 0, 0, 1, 1, 2], [0], [0]>} : vector<1x8x8xf32>, vector<1x8x16xf32>, vector<1x8x16xf32> -> vector<1x8x16xf32>
    %cst_17 = arith.constant 0.000000e+00 : f32
    "tpu.trace_stop"() : () -> ()
    %35 = vector.broadcast %cst_17 : f32 to vector<1x8x16xf32>
    %36 = arith.cmpf ogt, %34, %35 : vector<1x8x16xf32>
    %cst_18 = arith.constant 0.00999999977 : f32
    %37 = vector.broadcast %cst_18 : f32 to vector<1x8x16xf32>
    %38 = arith.mulf %37, %34 : vector<1x8x16xf32>
    %39 = arith.select %36, %34, %38 : vector<1x8x16xi1>, vector<1x8x16xf32>
    %40 = vector.shape_cast %39 : vector<1x8x16xf32> to vector<1x1x128xf32>
    %c0_19 = arith.constant 0 : index
    %c0_20 = arith.constant 0 : index
    %c0_21 = arith.constant 0 : index
    %41 = vector.load %arg5[%c0_19, %c0_20, %c0_21] : memref<1x1x128xf32, #tpu.memory_space<vmem>>, vector<1x1x128xf32>
    tpu.vector_store %arg5[%c0_19, %c0_20, %c0_21], %40 {strides = array<i32>} : memref<1x1x128xf32, #tpu.memory_space<vmem>>, vector<1x1x128xf32>,
    %42 = vector.shape_cast %33 : vector<1x8x8xf32> to vector<1x1x64xf32>
    %c0_22 = arith.constant 0 : index
    %c0_23 = arith.constant 0 : index
    %c0_24 = arith.constant 0 : index
    %43 = vector.load %arg6[%c0_22, %c0_23, %c0_24] : memref<1x1x64xf32, #tpu.memory_space<vmem>>, vector<1x1x64xf32>
    tpu.vector_store %arg6[%c0_22, %c0_23, %c0_24], %42 {strides = array<i32>} : memref<1x1x64xf32, #tpu.memory_space<vmem>>, vector<1x1x64xf32>,
    return
  }
  func.func @transform_0(%arg0: i32) -> (i32, i32, i32) {
    %c0_i32 = arith.constant 0 : i32
    %c0_i32_0 = arith.constant 0 : i32
    %c0_i32_1 = arith.constant 0 : i32
    return %arg0, %c0_i32, %c0_i32_0 : i32, i32, i32
  }
  func.func @transform_1(%arg0: i32) -> (i32, i32, i32) {
    %c0_i32 = arith.constant 0 : i32
    %c0_i32_0 = arith.constant 0 : i32
    %c0_i32_1 = arith.constant 0 : i32
    return %arg0, %c0_i32, %c0_i32_0 : i32, i32, i32
  }
  func.func @transform_2(%arg0: i32) -> (i32, i32) {
    %c0_i32 = arith.constant 0 : i32
    %c0_i32_0 = arith.constant 0 : i32
    %c0_i32_1 = arith.constant 0 : i32
    return %c0_i32, %c0_i32_0 : i32, i32
  }
  func.func @transform_3(%arg0: i32) -> (i32, i32) {
    %c0_i32 = arith.constant 0 : i32
    %c0_i32_0 = arith.constant 0 : i32
    %c0_i32_1 = arith.constant 0 : i32
    return %c0_i32, %c0_i32_0 : i32, i32
  }
  func.func @transform_4(%arg0: i32) -> (i32, i32, i32) {
    %c0_i32 = arith.constant 0 : i32
    %c0_i32_0 = arith.constant 0 : i32
    %c0_i32_1 = arith.constant 0 : i32
    return %arg0, %c0_i32, %c0_i32_0 : i32, i32, i32
  }
  func.func @transform_5(%arg0: i32) -> (i32, i32, i32) {
    %c0_i32 = arith.constant 0 : i32
    %c0_i32_0 = arith.constant 0 : i32
    %c0_i32_1 = arith.constant 0 : i32
    return %arg0, %c0_i32, %c0_i32_0 : i32, i32, i32
  }
}

module attributes {stable_mosaic.version = 11 : i64} {
  func.func @_gat_kernel(%arg0: i32, %arg1: memref<1x8x32xf32, #tpu.memory_space<vmem>>, %arg2: memref<1x8x8xi32, #tpu.memory_space<vmem>>, %arg3: memref<32x16xf32, #tpu.memory_space<vmem>>, %arg4: memref<2x16xf32, #tpu.memory_space<vmem>>, %arg5: memref<1x8x16xf32, #tpu.memory_space<vmem>>, %arg6: memref<1x8x8xf32, #tpu.memory_space<vmem>>) attributes {dimension_semantics = [#tpu.dimension_semantics<parallel>], iteration_bounds = array<i64: 2>, scalar_prefetch = 0 : i64, scratch_operands = 0 : i64, tpu.core_type = #tpu.core_type<tc>, window_params = [{transform_indices = @transform_0, window_bounds = array<i64: 1, 8, 32>}, {transform_indices = @transform_1, window_bounds = array<i64: 1, 8, 8>}, {pipeline_mode = #tpu.pipeline_mode<synchronous>, transform_indices = @transform_2, window_bounds = array<i64: 32, 16>}, {pipeline_mode = #tpu.pipeline_mode<synchronous>, transform_indices = @transform_3, window_bounds = array<i64: 2, 16>}, {transform_indices = @transform_4, window_bounds = array<i64: 1, 8, 16>}, {transform_indices = @transform_5, window_bounds = array<i64: 1, 8, 8>}]} {
    %c0 = arith.constant 0 : index
    %c0_0 = arith.constant 0 : index
    %c0_1 = arith.constant 0 : index
    %0 = vector.load %arg1[%c0, %c0_0, %c0_1] : memref<1x8x32xf32, #tpu.memory_space<vmem>>, vector<1x8x32xf32>
    %1 = vector.shape_cast %0 : vector<1x8x32xf32> to vector<8x32xf32>
    %c0_2 = arith.constant 0 : index
    %c0_3 = arith.constant 0 : index
    %2 = vector.load %arg3[%c0_2, %c0_3] : memref<32x16xf32, #tpu.memory_space<vmem>>, vector<32x16xf32>
    %cst = arith.constant dense<0.000000e+00> : vector<8x16xf32>
    %3 = tpu.matmul %1, %2, %cst {dimension_numbers = #tpu.dot_dimension_numbers<[1], [0], [0], [1], [0, 0, 1, 1], [], []>} : vector<8x32xf32>, vector<32x16xf32>, vector<8x16xf32> -> vector<8x16xf32>
    %4 = vector.shape_cast %3 : vector<8x16xf32> to vector<1x8x16xf32>
    %c0_4 = arith.constant 0 : index
    %c0_5 = arith.constant 0 : index
    %5 = vector.load %arg4[%c0_4, %c0_5] : memref<2x16xf32, #tpu.memory_space<vmem>>, vector<2x16xf32>
    %6 = vector.extract_strided_slice %5 {offsets = [0, 0], sizes = [1, 16], strides = [1, 1]} : vector<2x16xf32> to vector<1x16xf32>
    "tpu.trace_start"() <{level = 10 : i32, message = "no,ko->nk"}> : () -> ()
    %cst_6 = arith.constant dense<0.000000e+00> : vector<8x1xf32>
    %7 = tpu.matmul %3, %6, %cst_6 {dimension_numbers = #tpu.dot_dimension_numbers<[1], [1], [0], [0], [0, 0, 1, 0], [], []>} : vector<8x16xf32>, vector<1x16xf32>, vector<8x1xf32> -> vector<8x1xf32>
    "tpu.trace_stop"() : () -> ()
    %8 = vector.shape_cast %7 : vector<8x1xf32> to vector<1x8x1xf32>
    %9 = vector.extract_strided_slice %5 {offsets = [1, 0], sizes = [1, 16], strides = [1, 1]} : vector<2x16xf32> to vector<1x16xf32>
    %10 = vector.shape_cast %9 : vector<1x16xf32> to vector<1x1x16xf32>
    "tpu.trace_start"() <{level = 10 : i32, message = "bko,bno->bkn"}> : () -> ()
    %cst_7 = arith.constant dense<0.000000e+00> : vector<1x1x8xf32>
    %11 = tpu.matmul %10, %4, %cst_7 {dimension_numbers = #tpu.dot_dimension_numbers<[2], [2], [1], [1], [0, 0, 0, 1, 1, 1], [0], [0]>} : vector<1x1x16xf32>, vector<1x8x16xf32>, vector<1x1x8xf32> -> vector<1x1x8xf32>
    "tpu.trace_stop"() : () -> ()
    %12 = vector.broadcast %8 : vector<1x8x1xf32> to vector<1x8x8xf32>
    %13 = vector.broadcast %11 : vector<1x1x8xf32> to vector<1x8x8xf32>
    %14 = arith.addf %12, %13 : vector<1x8x8xf32>
    %cst_8 = arith.constant 0.000000e+00 : f32
    %15 = vector.broadcast %cst_8 : f32 to vector<1x8x8xf32>
    %16 = arith.cmpf ogt, %14, %15 : vector<1x8x8xf32>
    %cst_9 = arith.constant 1.000000e-01 : f32
    %17 = vector.broadcast %cst_9 : f32 to vector<1x8x8xf32>
    %18 = arith.mulf %17, %14 : vector<1x8x8xf32>
    %19 = arith.select %16, %14, %18 : vector<1x8x8xi1>, vector<1x8x8xf32>
    %c0_10 = arith.constant 0 : index
    %c0_11 = arith.constant 0 : index
    %c0_12 = arith.constant 0 : index
    %20 = vector.load %arg2[%c0_10, %c0_11, %c0_12] : memref<1x8x8xi32, #tpu.memory_space<vmem>>, vector<1x8x8xi32>
    %c0_i32 = arith.constant 0 : i32
    %21 = vector.broadcast %c0_i32 : i32 to vector<1x8x8xi32>
    %22 = arith.cmpi sgt, %20, %21 : vector<1x8x8xi32>
    %cst_13 = arith.constant -9.000000e+15 : f32
    %23 = vector.broadcast %cst_13 : f32 to vector<1x8x8xf32>
    %24 = arith.select %22, %19, %23 : vector<1x8x8xi1>, vector<1x8x8xf32>
    %cst_14 = arith.constant dense<0xFF800000> : vector<1x8xf32>
    %25 = vector.multi_reduction <maximumf>, %24, %cst_14 [2] : vector<1x8x8xf32> to vector<1x8xf32>
    %26 = vector.shape_cast %25 : vector<1x8xf32> to vector<1x8x1xf32>
    %27 = vector.broadcast %26 : vector<1x8x1xf32> to vector<1x8x8xf32>
    %28 = arith.subf %24, %27 : vector<1x8x8xf32>
    %29 = math.exp %28 : vector<1x8x8xf32>
    %cst_15 = arith.constant dense<0.000000e+00> : vector<1x8xf32>
    %30 = vector.multi_reduction <add>, %29, %cst_15 [2] : vector<1x8x8xf32> to vector<1x8xf32>
    %31 = vector.shape_cast %30 : vector<1x8xf32> to vector<1x8x1xf32>
    %32 = vector.broadcast %31 : vector<1x8x1xf32> to vector<1x8x8xf32>
    %33 = arith.divf %29, %32 : vector<1x8x8xf32>
    "tpu.trace_start"() <{level = 10 : i32, message = "bij,bjo->bio"}> : () -> ()
    %cst_16 = arith.constant dense<0.000000e+00> : vector<1x8x16xf32>
    %34 = tpu.matmul %33, %4, %cst_16 {dimension_numbers = #tpu.dot_dimension_numbers<[2], [1], [1], [2], [0, 0, 0, 1, 1, 2], [0], [0]>} : vector<1x8x8xf32>, vector<1x8x16xf32>, vector<1x8x16xf32> -> vector<1x8x16xf32>
    %cst_17 = arith.constant 0.000000e+00 : f32
    "tpu.trace_stop"() : () -> ()
    %35 = vector.broadcast %cst_17 : f32 to vector<1x8x16xf32>
    %36 = arith.cmpf ogt, %34, %35 : vector<1x8x16xf32>
    %cst_18 = arith.constant 0.00999999977 : f32
    %37 = vector.broadcast %cst_18 : f32 to vector<1x8x16xf32>
    %38 = arith.mulf %37, %34 : vector<1x8x16xf32>
    %39 = arith.select %36, %34, %38 : vector<1x8x16xi1>, vector<1x8x16xf32>
    %c0_19 = arith.constant 0 : index
    %c0_20 = arith.constant 0 : index
    %c0_21 = arith.constant 0 : index
    %40 = vector.load %arg5[%c0_19, %c0_20, %c0_21] : memref<1x8x16xf32, #tpu.memory_space<vmem>>, vector<1x8x16xf32>
    tpu.vector_store %arg5[%c0_19, %c0_20, %c0_21], %39 {strides = array<i32>} : memref<1x8x16xf32, #tpu.memory_space<vmem>>, vector<1x8x16xf32>,
    %c0_22 = arith.constant 0 : index
    %c0_23 = arith.constant 0 : index
    %c0_24 = arith.constant 0 : index
    %41 = vector.load %arg6[%c0_22, %c0_23, %c0_24] : memref<1x8x8xf32, #tpu.memory_space<vmem>>, vector<1x8x8xf32>
    tpu.vector_store %arg6[%c0_22, %c0_23, %c0_24], %33 {strides = array<i32>} : memref<1x8x8xf32, #tpu.memory_space<vmem>>, vector<1x8x8xf32>,
    return
  }
  func.func @transform_0(%arg0: i32) -> (i32, i32, i32) {
    %c0_i32 = arith.constant 0 : i32
    %c0_i32_0 = arith.constant 0 : i32
    %c0_i32_1 = arith.constant 0 : i32
    return %arg0, %c0_i32, %c0_i32_0 : i32, i32, i32
  }
  func.func @transform_1(%arg0: i32) -> (i32, i32, i32) {
    %c0_i32 = arith.constant 0 : i32
    %c0_i32_0 = arith.constant 0 : i32
    %c0_i32_1 = arith.constant 0 : i32
    return %arg0, %c0_i32, %c0_i32_0 : i32, i32, i32
  }
  func.func @transform_2(%arg0: i32) -> (i32, i32) {
    %c0_i32 = arith.constant 0 : i32
    %c0_i32_0 = arith.constant 0 : i32
    %c0_i32_1 = arith.constant 0 : i32
    return %c0_i32, %c0_i32_0 : i32, i32
  }
  func.func @transform_3(%arg0: i32) -> (i32, i32) {
    %c0_i32 = arith.constant 0 : i32
    %c0_i32_0 = arith.constant 0 : i32
    %c0_i32_1 = arith.constant 0 : i32
    return %c0_i32, %c0_i32_0 : i32, i32
  }
  func.func @transform_4(%arg0: i32) -> (i32, i32, i32) {
    %c0_i32 = arith.constant 0 : i32
    %c0_i32_0 = arith.constant 0 : i32
    %c0_i32_1 = arith.constant 0 : i32
    return %arg0, %c0_i32, %c0_i32_0 : i32, i32, i32
  }
  func.func @transform_5(%arg0: i32) -> (i32, i32, i32) {
    %c0_i32 = arith.constant 0 : i32
    %c0_i32_0 = arith.constant 0 : i32
    %c0_i32_1 = arith.constant 0 : i32
    return %arg0, %c0_i32, %c0_i32_0 : i32, i32, i32
  }
}

</mosaic_0001>

<bundles_post_ra>
// kernel: tpu_custom_call.1
= control target key start
LH: loop header
LB: loop body
LE: loop exit
PB: predicated region body
PF: predicated region fallthrough
CT: control target
= control target key end

     0   :  { %11 = vsyncpa [#allocation3], 0  ;;  %s1025_s0 = inlined_call_operand.vmem [shape: f32[2,8,32], index: 0, kind: input, shape index: {}]   ;;  %s1026_s1 = inlined_call_operand.vmem [shape: s32[2,8,8], index: 1, kind: input, shape index: {}]   ;;  %s1027_s2 = inlined_call_operand.vmem [shape: f32[32,16], index: 2, kind: input, shape index: {}]   ;;  %s1028_s3 = inlined_call_operand.vmem [shape: f32[2,16], index: 3, kind: input, shape index: {}]   ;;  %s1029_s4 = inlined_call_operand.hbm [shape: f32[2,1,128], index: 4, kind: output, shape index: {0}]   ;;  %s1030_s5 = inlined_call_operand.hbm [shape: f32[2,1,64], index: 5, kind: output, shape index: {1}]  }
   0x1   :  { %13 = vsyncpa [#allocation3 + $0x1], 0 }
   0x2   :  { %14 = vsyncpa [#allocation5], 0 }
   0x3   :  { %16 = vsyncpa [#allocation5 + $0x1], 0  ;;  %s863_s18 = smov 0   ;;  %s865_s19 = smov 0  }
   0x4   :  { %s867_s20 = smov 0   ;;  %s869_s21 = smov 0  }
   0x5 LB: > { %s884_s22 = sadd.s32 4294967295, %s818_s21   ;;  %s651_s23 = sadd.s32 4294967294, %s818_s21   ;;  %s818_s21 = sphi %s869_s21, %s1036_s21   ;;  %s814_s20 = sphi %s867_s20, %s1035_s20   ;;  %s810_s19 = sphi %s865_s19, %s1034_s19   ;;  %s806_s18 = sphi %s863_s18, %s1033_s18  }
   0x6   : > { %s888_s24 = sadd.s32 1, %s818_s21   ;;  %s123_s25 = sadd.s32 1, %s814_s20 }
   0x7   : > { %s120_s26 = ssub.s32 %s818_s21, %s888_s24  ;;  %p133_p0 = scmp.ne.s32.totalorder %s814_s20, %s810_s19 }
   0x8   : > { %p121_p1 = scmp.eq.s32.totalorder %s120_s26, 0  ;;  %p134_p2 = scmp.eq.s32.totalorder %s884_s22, 1 }
   0x9   : > { %p139_p3 = scmp.ne.s32.totalorder %s810_s19, %s806_s18  ;;  %p140_p4 = scmp.eq.s32.totalorder %s651_s23, 1 }
   0xa   : > { %s899_s27 = scalar_select %p121_p1, %s814_s20, %s123_s25  }
   0xb   : > { %p901_p5 = por %p134_p2, %p133_p0  ;;  %p905_p6 = por %p140_p4, %p139_p3 }
   0xc   : > { %p654_p7 = scmp.ge.s32.totalorder %s818_s21, 1  ;;  %p204_p8 = scmp.lt.s32.totalorder %s818_s21, 3 }
   0xe   : > { %p205_p9 = pnand %p654_p7, %p204_p8 }
   0xf   : > { %p238_p10 = scmp.lt.s32.totalorder (!%p205_p9), %s884_s22, 1  ;;  %s822_s7 = smov (!%p205_p9), 8  }
  0x10   : > { %208 = sbr.rel (%p205_p9) target bundleno = 840 (0x348), region = 36  ;;  %s823_s8 = smov (!%p205_p9), 16  }
  0x11   : > { %s824_s9 = smov (!%p205_p9), 32   ;;  %s825_s10 = smov (!%p205_p9), 24  }
  0x12   : > { %s827_s12 = smov (!%p205_p9), 80   ;;  %s828_s13 = smov (!%p205_p9), 64  }
  0x13   : > { %s830_s15 = smov (!%p205_p9), 48   ;;  %s831_s16 = smov (!%p205_p9), 56  }
  0x14   : > { %s961_s23 = sand.u32 (!%p205_p9), 1, %s810_s19   ;;  %s539_s30 = scalar_lea.hbm (!%p205_p9), %s1029_s4, %s884_s22 }
  0x15   : > { %v250_v0 = vld [vmem:[%s1027_s2 + $0x18] sm:$0xff]  ;;  %v249_v1 = vld [vmem:[%s1027_s2 + $0x10] sm:$0xff]  ;;  %v248_v2 = vld [vmem:[%s1027_s2 + $0x8] sm:$0xff]  ;;  %s239_s11 = scalar_select %p238_p10, %s884_s22, 1  ;;  %vm251_vm0 = vcmask 261120   ;;  %vm278_vm1 = vcmask 130048  }
  0x16   : > { %267 = vmatpush.msra.mxu0 %v250_v0  ;;  %v247_v3 = vld [vmem:[%s1027_s2] sm:$0xff]  ;;  %vm317_vm4 = vcmask 64512   ;;  %v820_v32 = vmov 1983009808   ;;  %v821_v35 = vmov 1934713408  }
  0x17   : > { %s655_s14 = sshll.u32 %s239_s11, 3  ;;  %v275_v5 = vld [vmem:[%s1028_s3] sm:$0x3]  ;;  %v372_v33 = vunpack.c.l.s4 %v820_v32  ;;  %v382_v36 = vunpack.c.l.s4 %v821_v35  ;;  %vm369_vm9 = vcmask 1047556   ;;  %s826_s11 = smov 40   ;;  %vm437_vm11 = vcmask 392192  }
  0x18   : > { %268 = vmatpush.msra.mxu0 %v249_v1  ;;  %s241_s17 = scalar_lea.vmem %s1025_s0, %s655_s14  ;;  %v276_v6 = vperm.slane %v275_v5, 0  ;;  %v283_v8 = vrot.slane %v275_v5, 1  ;;  %s245_s6 = scalar_lea.vmem %s1026_s1, %s655_s14  ;;  %vm439_vm12 = vcmask 523264   ;;  %vm441_vm13 = vcmask 654336  }
  0x19   : > { %v246_v4 = vld [vmem:[%s241_s17] sm:$0xff]  ;;  %v373_v39 = vunpack.c.0.s8 %v372_v33  ;;  %v383_v42 = vunpack.c.0.s8 %v382_v36  ;;  %s829_s14 = smov 96   ;;  %s832_s17 = smov 112   ;;  %vm516_vm14 = vcmask 195584   ;;  %vm443_vm15 = vcmask 785408  }
  0x1a   : > { %269 = vmatpush.msra.mxu0 %v248_v2  ;;  %v314_v14 = vld [vmem:[%s245_s6] sm:$0xff]  ;;  %s231_s6 = scalar_lea.vmem [#allocation2], %s961_s23 }
  0x1b   : > { %vm315_vm3 = vcmp.gt.s32.totalorder %v314_v14, 0 }
  0x1c   : > { %270 = vmatpush.msra.mxu0 %v247_v3 }
  0x1d   : > { %657 = vmatmul.msk.f32.vlgmr.msra.gmra.mxu0 %vm251_vm0, %v246_v4 }
  0x9a   : > { %v272_v7 = vpop.f32.mrf.mxu0 }
  0x9b   : > { %658 = vmatpush.xpose.msk.msra.mxu1 %vm278_vm1, %v272_v7  ;;  %360 = vmatpush.msra.mxu2 %v272_v7  ;;  %v277_v9 = vmul.f32 %v276_v6, %v272_v7 }
  0x9d   : > { %v279_v10 = vsel %vm278_vm1, %v277_v9, 0.0 }
  0x9e   : > { %659 = vmatmul.msk.f32.vlgmr.msra.gmra.mxu1 %vm278_vm1, %v283_v8  ;;  %280 = vadd.xlane.f32.xlu0 %v279_v10 }
 0x111   : > { %v281_v13 = vpop.xlane.xlu0 %280 }
 0x11b   : > { %v306_v11 = vpop.f32.mrf.mxu1 }
 0x11c   : > { %v309_v12 = vperm.slane %v306_v11, 0 }
 0x11e   : > { %v310_v15 = vadd.f32 %v309_v12, %v281_v13 }
 0x120   : > { %v312_v16 = vmul.f32 0.1, %v310_v15  ;;  %vm311_vm2 = vcmp.gt.f32.partialorder %v310_v15, 0.0 }
 0x122   : > { %v313_v17 = vsel %vm311_vm2, %v310_v15, %v312_v16  ;;  %vm445_vm2 = vcmask 916480  }
 0x123   : > { %v316_v18 = vsel %vm315_vm3, %v313_v17, -9e+15 }
 0x124   : > { %v318_v19 = vsel %vm317_vm4, %v316_v18, -inf }
 0x125   : > { %319 = vmax.xlane.f32.xlu0 %v318_v19 }
 0x198   : > { %v320_v20 = vpop.xlane.xlu0 %319 }
 0x199   : > { %v321_v21 = vsub.f32 %v316_v18, %v320_v20 }
 0x19b   : > { %v322_v22 = vmul.f32 1.442695, %v321_v21 }
 0x19d   : > { %720 = vpow2.f32 %v322_v22 }
 0x1a3   : > { %v721_v23 = vpop.eup %720 }
 0x1a4   : > { %v324_v24 = vsel %vm317_vm4, %v721_v23, 0.0 }
 0x1a5   : > { %325 = vadd.xlane.f32.xlu1 %v324_v24 }
 0x218   : > { %v326_v25 = vpop.xlane.xlu1 %325 }
 0x219   : > { %722 = vrcp.f32 %v326_v25  ;;  %v338_v29 = vand.u32 2147483648, %v326_v25  ;;  %v336_v31 = vand.u32 2147483647, %v326_v25  ;;  %vm332_vm6 = vweird.f32 %v326_v25 }
 0x21b   : > { %v339_v37 = vor.u32 1.1754944e-38, %v338_v29  ;;  %vm337_vm8 = vcmp.eq.f32.partialorder %v336_v31, 8.507059e+37 }
 0x21f   : > { %v723_v26 = vpop.eup %722 }
 0x220   : > { %v328_v27 = vmul.f32 %v723_v26, %v326_v25  ;;  %vm333_vm5 = vweird.f32 %v723_v26 }
 0x221   : > { %vm334_vm7 = vmor %vm332_vm6, %vm333_vm5 }
 0x222   : > { %v329_v28 = vsub.f32 1.0, %v328_v27 }
 0x224   : > { %v330_v30 = vmul.f32 %v723_v26, %v329_v28 }
 0x226   : > { %v331_v34 = vadd.f32 %v723_v26, %v330_v30 }
 0x228   : > { %v335_v38 = vsel %vm334_vm7, %v723_v26, %v331_v34 }
 0x229   : > { %v340_v40 = vsel %vm337_vm8, %v339_v37, %v335_v38 }
 0x22a   : > { %v341_v41 = vmul.f32 %v721_v23, %v340_v40 }
 0x22c   : > { %660 = vmatmul.msk.f32.vlgmr.msra.gmra.mxu2 %vm317_vm4, %v341_v41  ;;  %v448_v43 = vrot.slane %v341_v41, 4  ;;  %v453_v44 = vperm.slane %v341_v41, %v373_v39 }
 0x22e   : > { %v941_v45 = vperm.slane %v453_v44, %v383_v42  ;;  %v458_v46 = vrot.slane %v453_v44, 4  ;;  %v449_v47 = vsel %vm369_vm9, 0.0, %v448_v43 }
 0x22f   : > { %v457_v48 = vperm.slane %v449_v47, %v373_v39 }
 0x230   : > { %v478_v49 = vrot.slane %v941_v45, 4  ;;  %v459_v50 = vsel %vm369_vm9, 0.0, %v458_v46 }
 0x231   : > { %v467_v51 = vperm.slane %v459_v50, %v383_v42  ;;  %v473_v52 = vperm.slane %v457_v48, %v383_v42  ;;  %v468_v10 = vrot.slane %v457_v48, 4 }
 0x232   : > { %v479_v53 = vsel %vm369_vm9, 0.0, %v478_v49 }
 0x233   : > { %487 = vrot.lane.b32.xlu2 %v479_v53, %s822_s7  ;;  %491 = vrot.lane.b32.xlu0 %v467_v51, %s823_s8  ;;  %v480_v54 = vrot.slane %v467_v51, 4  ;;  %v482_v56 = vrot.slane %v473_v52, 4  ;;  %v469_v13 = vsel %vm369_vm9, 0.0, %v468_v10  ;;  %s972_s7 = sshll.u32 %s231_s6, 4  ;;  %s542_s7 = int_to_ptr.vmem [resolvable:$true] %s972_s7 }
 0x234   : > { %499 = vrot.lane.b32.xlu1 %v473_v52, %s824_s9  ;;  %v477_v15 = vperm.slane %v469_v13, %v383_v42 }
 0x235   : > { %v481_v55 = vsel %vm369_vm9, 0.0, %v480_v54  ;;  %v483_v57 = vsel %vm369_vm9, 0.0, %v482_v56 }
 0x236   : > { %v484_v17 = vrot.slane %v477_v15, 4 }
 0x238   : > { %v485_v19 = vsel %vm369_vm9, 0.0, %v484_v17 }
 0x23b   : > { %495 = vrot.lane.b32.xlu2 %v481_v55, %s825_s10 }
 0x243   : > { %503 = vrot.lane.b32.xlu2 %v483_v57, %s826_s11  ;;  %s552_s11 = scalar_lea.hbm %s1030_s5, %s884_s22 }
 0x28d   : > { %v488_v22 = vpop.permute.xlu2 %487 }
 0x28e   : > { %v514_v35 = vsel %vm317_vm4, %v941_v45, %v488_v22 }
 0x295   : > { %v496_v23 = vpop.permute.xlu2 %495 }
 0x29d   : > { %v504_v24 = vpop.permute.xlu2 %503 }
 0x2a5   : > { %v492_v28 = vpop.permute.xlu0 %491 }
 0x2a6   : > { %v500_v27 = vpop.permute.xlu1 %499  ;;  %v515_v37 = vsel %vm278_vm1, %v514_v35, %v492_v28 }
 0x2a7   : > { %v517_v40 = vsel %vm516_vm14, %v515_v37, %v496_v23 }
 0x2a8   : > { %v518_v44 = vsel %vm251_vm0, %v517_v40, %v500_v27 }
 0x2af   : > { %v362_v58 = vpop.f32.mrf.mxu2 }
 0x2b0   : > { %vm365_vm10 = vcmp.gt.f32.partialorder %v362_v58, 0.0  ;;  %v366_v59 = vmul.f32 0.01, %v362_v58 }
 0x2b2   : > { %v367_v60 = vsel %vm365_vm10, %v362_v58, %v366_v59 }
 0x2b3   : > { %v368_v61 = vrot.slane %v367_v60, 4  ;;  %v374_v62 = vperm.slane %v367_v60, %v373_v39 }
 0x2b5   : > { %v370_v63 = vsel %vm369_vm9, 0.0, %v368_v61  ;;  %v379_v0 = vrot.slane %v374_v62, 4  ;;  %v384_v1 = vperm.slane %v374_v62, %v383_v42 }
 0x2b6   : > { %v378_v2 = vperm.slane %v370_v63, %v373_v39 }
 0x2b7   : > { %v399_v3 = vrot.slane %v384_v1, 4  ;;  %v380_v4 = vsel %vm369_vm9, 0.0, %v379_v0 }
 0x2b8   : > { %v388_v5 = vperm.slane %v380_v4, %v383_v42  ;;  %v394_v6 = vperm.slane %v378_v2, %v383_v42  ;;  %v389_v8 = vrot.slane %v378_v2, 4 }
 0x2b9   : > { %v400_v7 = vsel %vm369_vm9, 0.0, %v399_v3 }
 0x2ba   : > { %408 = vrot.lane.b32.xlu1 %v400_v7, %s823_s8  ;;  %412 = vrot.lane.b32.xlu2 %v388_v5, %s824_s9  ;;  %v403_v9 = vrot.slane %v394_v6, 4  ;;  %v390_v12 = vsel %vm369_vm9, 0.0, %v389_v8  ;;  %v401_v16 = vrot.slane %v388_v5, 4  ;;  %s974_s8 = sshll.u32 %s539_s30, 4  ;;  %s544_s8 = int_to_ptr.hbm [resolvable:$true] %s974_s8 }
 0x2bb   : > { %v398_v14 = vperm.slane %v390_v12, %v383_v42 }
 0x2bc   : > { %v404_v11 = vsel %vm369_vm9, 0.0, %v403_v9  ;;  %v402_v18 = vsel %vm369_vm9, 0.0, %v401_v16 }
 0x2bd   : > { %424 = vrot.lane.b32.xlu0 %v404_v11, %s827_s12  ;;  %v405_v20 = vrot.slane %v398_v14, 4  ;;  %s527_s12 = scalar_lea.sflag [#allocation3], %s961_s23 }
 0x2bf   : > { %v406_v21 = vsel %vm369_vm9, 0.0, %v405_v20 }
 0x2c2   : > { %420 = vrot.lane.b32.xlu2 %v394_v6, %s828_s13  ;;  %428 = vrot.lane.b32.xlu1 %v398_v14, %s829_s14  ;;  %s738_s13 = sshra.s32 %s544_s8, 4  ;;  %s739_s13 = int_to_ptr.hbm [resolvable:$true] %s738_s13 }
 0x2c3   : > { %s740_s14 = scalar_lea.hbm %s739_s13, 1  ;;  %p745_p0 = scmp.lt.s32.totalorder %s739_s13, %s1029_s4 }
 0x2c4   : > { %p741_p11 = scmp.ne.s32.totalorder %s739_s13, %s740_s14 }
 0x2c5   : > { %507 = vrot.lane.b32.xlu0 %v477_v15, %s830_s15 }
 0x2c6   : > { %p742_p12 = pnand %p741_p11, %p901_p5 }
 0x2c8   : > { %p743_p13 = pneg %p742_p12 }
 0x2ca   : > { %416 = vrot.lane.b32.xlu2 %v402_v18, %s830_s15  ;;  %511 = vrot.lane.b32.xlu1 %v485_v19, %s831_s16 }
 0x2d2   : > { %432 = vrot.lane.b32.xlu2 %v406_v21, %s832_s17  ;;  %s744_s17 = scalar_lea.hbm %s1029_s4, 2 }
 0x2d3   : > { %p746_p1 = scmp.lt.s32.totalorder %s744_s17, %s740_s14 }
 0x2d5   : > { %p747_p2 = por %p746_p1, %p745_p0 }
 0x2d7   : > { %p748_p3 = pnand %p747_p2, %p743_p13 }
 0x314   : > { %v413_v25 = vpop.permute.xlu2 %412 }
 0x31c   : > { %v421_v26 = vpop.permute.xlu2 %420 }
 0x324   : > { %v417_v29 = vpop.permute.xlu2 %416 }
 0x32c   : > { %v409_v30 = vpop.permute.xlu1 %408  ;;  %v433_v41 = vpop.permute.xlu2 %432 }
 0x32d   : > { %v435_v31 = vsel %vm278_vm1, %v384_v1, %v409_v30  ;;  %vm519_vm1 = vcmask 326656  }
 0x32e   : > { %v436_v32 = vsel %vm251_vm0, %v435_v31, %v413_v25 }
 0x32f   : > { %v438_v33 = vsel %vm437_vm11, %v436_v32, %v417_v29  ;;  %v425_v34 = vpop.permute.xlu0 %424 }
 0x330   : > { %v440_v36 = vsel %vm439_vm12, %v438_v33, %v421_v26 }
 0x331   : > { %v442_v38 = vsel %vm441_vm13, %v440_v36, %v425_v34 }
 0x334   : > { %v429_v39 = vpop.permute.xlu1 %428 }
 0x335   : > { %v444_v42 = vsel %vm443_vm15, %v442_v38, %v429_v39 }
 0x336   : > { %v446_v43 = vsel %vm445_vm2, %v444_v42, %v433_v41 }
 0x337   : > { %447 = vst [vmem:[%s231_s6] sm:$0x1] %v446_v43 }
 0x338   : > { %751 = shalt.err (!%p748_p3)
}
 0x339   : > { %663 = dma.vmem_to_hbm [thread:$0]  (%p901_p5), %s542_s7, 16, %s544_s8, %s527_s12   ;;  %v508_v45 = vpop.permute.xlu0 %507  ;;  %vm522_vm0 = vcmask 457728   ;;  %v520_v46 = vsel %vm519_vm1, %v518_v44, %v504_v24  ;;  %vm524_vm3 = vcmask 516096  }
 0x33a   : > { %s237_s22 = scalar_lea.vmem [#allocation4], %s961_s23  ;;  %s556_s6 = sshll.u32 %s552_s11, 4  ;;  %v521_v47 = vsel %vm437_vm11, %v520_v46, %v508_v45  ;;  %s557_s6 = int_to_ptr.hbm [resolvable:$true] %s556_s6 }
 0x33b   : > { %s554_s30 = sshll.u32 %s237_s22, 4  ;;  %s531_s9 = scalar_lea.sflag [#allocation5], %s961_s23  ;;  %s555_s30 = int_to_ptr.vmem [resolvable:$true] %s554_s30 }
 0x33c   : > { %v512_v48 = vpop.permute.xlu1 %511  ;;  %s766_s10 = sshra.s32 %s557_s6, 4  ;;  %s772_s12 = scalar_lea.hbm %s1030_s5, 2  ;;  %s767_s10 = int_to_ptr.hbm [resolvable:$true] %s766_s10 }
 0x33d   : > { %v523_v49 = vsel %vm522_vm0, %v521_v47, %v512_v48  ;;  %s768_s7 = scalar_lea.hbm %s767_s10, 1  ;;  %p773_p9 = scmp.lt.s32.totalorder %s767_s10, %s1030_s5 }
 0x33e   : > { %525 = vst.msk [vmem:[%s237_s22] sm:$0x1] %vm524_vm3, %v523_v49  ;;  %p769_p4 = scmp.ne.s32.totalorder %s767_s10, %s768_s7  ;;  %p774_p10 = scmp.lt.s32.totalorder %s772_s12, %s768_s7 }
 0x340   : > { %p770_p7 = pnand %p769_p4, %p901_p5  ;;  %p775_p11 = por %p774_p10, %p773_p9 }
 0x342   : > { %p771_p8 = pneg %p770_p7 }
 0x344   : > { %p776_p12 = pnand %p775_p11, %p771_p8 }
 0x346   : > { %779 = shalt.err (!%p776_p12)
}
 0x347   : > { %664 = dma.vmem_to_hbm [thread:$0]  (%p901_p5), %s555_s30, 16, %s557_s6, %s531_s9  }
 0x348 PF: > { %p674_p13 = scmp.ge.s32.totalorder %s818_s21, 2  ;;  %s568_s23 = sand.u32 1, %s806_s18  }
 0x349   : > { %s569_s15 = scalar_lea.sflag [#allocation3], %s568_s23 }
 0x34a   : > { %p668_p0 = pnand %p674_p13, %p905_p6 }
 0x34c   : > { %p669_p1 = pneg %p668_p0 }
 0x34e   : > { %797 = dma.done.wait (%p669_p1), %s569_s15, 16  }
 0x34f   : > { %799 = vsyncadd (%p669_p1), %s569_s15, 4294967280  ;;  %s578_s16 = scalar_lea.sflag [#allocation5], %s568_s23 }
 0x350   : > { %801 = dma.done.wait (%p669_p1), %s578_s16, 16  }
 0x351   : > { %803 = vsyncadd (%p669_p1), %s578_s16, 4294967280  ;;  %p19_p5 = scmp.ge.s32.totalorder %s888_s24, 4   ;;  %s1033_s18 = smov %s810_s19 }
 0x352   : > { %s1034_s19 = smov %s814_s20  ;;  %s1035_s20 = smov %s899_s27 }
 0x353   : > { %s1036_s21 = smov %s888_s24  ;;  %21 = sbr.rel (!%p19_p5) target bundleno = 5 (0x5), region = 91 }
 0x358   :  { %583 = vsyncpa [#allocation3], 1 }
 0x359   :  { %585 = vsyncpa [#allocation3 + $0x1], 1 }
 0x35a   :  { %586 = vsyncpa [#allocation5], 1 }
 0x35b   :  { %588 = vsyncpa [#allocation5 + $0x1], 1 }

// kernel: tpu_custom_call.1
= control target key start
LH: loop header
LB: loop body
LE: loop exit
PB: predicated region body
PF: predicated region fallthrough
CT: control target
= control target key end

     0   :  { %11 = vsyncpa [#allocation3], 0  ;;  %s836_s0 = inlined_call_operand.vmem [shape: f32[2,8,32], index: 0, kind: input, shape index: {}]   ;;  %s837_s1 = inlined_call_operand.vmem [shape: s32[2,8,8], index: 1, kind: input, shape index: {}]   ;;  %s838_s2 = inlined_call_operand.vmem [shape: f32[32,16], index: 2, kind: input, shape index: {}]   ;;  %s839_s3 = inlined_call_operand.vmem [shape: f32[2,16], index: 3, kind: input, shape index: {}]   ;;  %s840_s4 = inlined_call_operand.hbm [shape: f32[2,8,16], index: 4, kind: output, shape index: {0}]   ;;  %s841_s5 = inlined_call_operand.hbm [shape: f32[2,8,8], index: 5, kind: output, shape index: {1}]  }
   0x1   :  { %13 = vsyncpa [#allocation3 + $0x1], 0 }
   0x2   :  { %14 = vsyncpa [#allocation5], 0 }
   0x3   :  { %16 = vsyncpa [#allocation5 + $0x1], 0  ;;  %s703_s18 = smov 0   ;;  %s705_s19 = smov 0  }
   0x4   :  { %s707_s20 = smov 0   ;;  %s709_s21 = smov 0  }
   0x5 LB: > { %s724_s22 = sadd.s32 4294967295, %s671_s21   ;;  %s511_s23 = sadd.s32 4294967294, %s671_s21   ;;  %s671_s21 = sphi %s709_s21, %s847_s21   ;;  %s667_s20 = sphi %s707_s20, %s846_s20   ;;  %s663_s19 = sphi %s705_s19, %s845_s19   ;;  %s659_s18 = sphi %s703_s18, %s844_s18  }
   0x6   : > { %s728_s24 = sadd.s32 1, %s671_s21   ;;  %s123_s25 = sadd.s32 1, %s667_s20 }
   0x7   : > { %s120_s26 = ssub.s32 %s671_s21, %s728_s24  ;;  %p133_p0 = scmp.ne.s32.totalorder %s667_s20, %s663_s19 }
   0x8   : > { %p121_p1 = scmp.eq.s32.totalorder %s120_s26, 0  ;;  %p134_p2 = scmp.eq.s32.totalorder %s724_s22, 1 }
   0x9   : > { %p139_p3 = scmp.ne.s32.totalorder %s663_s19, %s659_s18  ;;  %p140_p4 = scmp.eq.s32.totalorder %s511_s23, 1 }
   0xa   : > { %s739_s27 = scalar_select %p121_p1, %s667_s20, %s123_s25  }
   0xb   : > { %p741_p5 = por %p134_p2, %p133_p0  ;;  %p745_p6 = por %p140_p4, %p139_p3 }
   0xc   : > { %p514_p7 = scmp.ge.s32.totalorder %s671_s21, 1  ;;  %p204_p8 = scmp.lt.s32.totalorder %s671_s21, 3 }
   0xe   : > { %p205_p9 = pnand %p514_p7, %p204_p8 }
   0xf   : > { %p240_p10 = scmp.lt.s32.totalorder (!%p205_p9), %s724_s22, 1  ;;  %s780_s7 = sand.u32 (!%p205_p9), 1, %s663_s19  }
  0x10   : > { %208 = sbr.rel (%p205_p9) target bundleno = 694 (0x2b6), region = 36  ;;  %s515_s8 = sshll.u32 (!%p205_p9), %s780_s7, 3 }
  0x11   : > { %s239_s9 = scalar_lea.vmem (!%p205_p9), [#allocation4], %s515_s8  ;;  %s525_s10 = sshll.u32 (!%p205_p9), %s724_s22, 3 }
  0x12   : > { %s402_s13 = scalar_lea.hbm (!%p205_p9), %s841_s5, %s525_s10  ;;  %s378_s16 = scalar_lea.sflag (!%p205_p9), [#allocation5], %s780_s7 }
  0x13   : > { %s406_s15 = sshll.u32 (!%p205_p9), %s402_s13, 4  ;;  %s407_s15 = int_to_ptr.hbm [resolvable:$true] %s406_s15 }
  0x15   : > { %v252_v0 = vld [vmem:[%s838_s2 + $0x18] sm:$0xff]  ;;  %v251_v1 = vld [vmem:[%s838_s2 + $0x10] sm:$0xff]  ;;  %v250_v2 = vld [vmem:[%s838_s2 + $0x8] sm:$0xff]  ;;  %s241_s11 = scalar_select %p240_p10, %s724_s22, 1  ;;  %vm253_vm0 = vcmask 261120   ;;  %vm280_vm1 = vcmask 130048  }
  0x16   : > { %269 = vmatpush.msra.mxu0 %v252_v0  ;;  %v249_v3 = vld [vmem:[%s838_s2] sm:$0xff]  ;;  %vm319_vm4 = vcmask 64512   ;;  %s597_s22 = scalar_lea.hbm %s841_s5, 16 }
  0x17   : > { %s517_s14 = sshll.u32 %s241_s11, 3  ;;  %v277_v5 = vld [vmem:[%s839_s3] sm:$0x3] }
  0x18   : > { %270 = vmatpush.msra.mxu0 %v251_v1  ;;  %s243_s17 = scalar_lea.vmem %s836_s0, %s517_s14  ;;  %v278_v6 = vperm.slane %v277_v5, 0  ;;  %v285_v8 = vrot.slane %v277_v5, 1  ;;  %s247_s6 = scalar_lea.vmem %s837_s1, %s517_s14 }
  0x19   : > { %v248_v4 = vld [vmem:[%s243_s17] sm:$0xff]  ;;  %s404_s14 = sshll.u32 %s239_s9, 4  ;;  %s591_s17 = sshra.s32 %s407_s15, 4  ;;  %s405_s14 = int_to_ptr.vmem [resolvable:$true] %s404_s14  ;;  %s592_s17 = int_to_ptr.hbm [resolvable:$true] %s591_s17 }
  0x1a   : > { %271 = vmatpush.msra.mxu0 %v250_v2  ;;  %v316_v14 = vld [vmem:[%s247_s6] sm:$0xff]  ;;  %s593_s23 = scalar_lea.hbm %s592_s17, 8  ;;  %p598_p0 = scmp.lt.s32.totalorder %s592_s17, %s841_s5 }
  0x1b   : > { %vm317_vm3 = vcmp.gt.s32.totalorder %v316_v14, 0  ;;  %p594_p11 = scmp.ne.s32.totalorder %s592_s17, %s593_s23  ;;  %p599_p1 = scmp.lt.s32.totalorder %s597_s22, %s593_s23 }
  0x1c   : > { %272 = vmatpush.msra.mxu0 %v249_v3 }
  0x1d   : > { %519 = vmatmul.msk.f32.vlgmr.msra.gmra.mxu0 %vm253_vm0, %v248_v4  ;;  %p595_p12 = pnand %p594_p11, %p741_p5  ;;  %p600_p2 = por %p599_p1, %p598_p0 }
  0x1f   : > { %p596_p13 = pneg %p595_p12 }
  0x21   : > { %p601_p3 = pnand %p600_p2, %p596_p13 }
  0x9a   : > { %v274_v7 = vpop.f32.mrf.mxu0 }
  0x9b   : > { %520 = vmatpush.xpose.msk.msra.mxu1 %vm280_vm1, %v274_v7  ;;  %362 = vmatpush.msra.mxu2 %v274_v7  ;;  %v279_v9 = vmul.f32 %v278_v6, %v274_v7 }
  0x9d   : > { %v281_v10 = vsel %vm280_vm1, %v279_v9, 0.0 }
  0x9e   : > { %521 = vmatmul.msk.f32.vlgmr.msra.gmra.mxu1 %vm280_vm1, %v285_v8  ;;  %282 = vadd.xlane.f32.xlu0 %v281_v10 }
 0x111   : > { %v283_v13 = vpop.xlane.xlu0 %282 }
 0x11b   : > { %v308_v11 = vpop.f32.mrf.mxu1 }
 0x11c   : > { %v311_v12 = vperm.slane %v308_v11, 0 }
 0x11e   : > { %v312_v15 = vadd.f32 %v311_v12, %v283_v13 }
 0x120   : > { %v314_v16 = vmul.f32 0.1, %v312_v15  ;;  %vm313_vm2 = vcmp.gt.f32.partialorder %v312_v15, 0.0 }
 0x122   : > { %v315_v17 = vsel %vm313_vm2, %v312_v15, %v314_v16 }
 0x123   : > { %v318_v18 = vsel %vm317_vm3, %v315_v17, -9e+15 }
 0x124   : > { %v320_v19 = vsel %vm319_vm4, %v318_v18, -inf }
 0x125   : > { %321 = vmax.xlane.f32.xlu0 %v320_v19 }
 0x198   : > { %v322_v20 = vpop.xlane.xlu0 %321 }
 0x199   : > { %v323_v21 = vsub.f32 %v318_v18, %v322_v20 }
 0x19b   : > { %v324_v22 = vmul.f32 1.442695, %v323_v21 }
 0x19d   : > { %573 = vpow2.f32 %v324_v22 }
 0x1a3   : > { %v574_v23 = vpop.eup %573 }
 0x1a4   : > { %v326_v24 = vsel %vm319_vm4, %v574_v23, 0.0 }
 0x1a5   : > { %327 = vadd.xlane.f32.xlu1 %v326_v24 }
 0x218   : > { %v328_v25 = vpop.xlane.xlu1 %327 }
 0x219   : > { %575 = vrcp.f32 %v328_v25  ;;  %v340_v29 = vand.u32 2147483648, %v328_v25  ;;  %v338_v31 = vand.u32 2147483647, %v328_v25  ;;  %vm334_vm6 = vweird.f32 %v328_v25 }
 0x21b   : > { %v341_v33 = vor.u32 1.1754944e-38, %v340_v29  ;;  %vm339_vm8 = vcmp.eq.f32.partialorder %v338_v31, 8.507059e+37 }
 0x21f   : > { %v576_v26 = vpop.eup %575 }
 0x220   : > { %v330_v27 = vmul.f32 %v576_v26, %v328_v25  ;;  %vm335_vm5 = vweird.f32 %v576_v26 }
 0x221   : > { %vm336_vm7 = vmor %vm334_vm6, %vm335_vm5 }
 0x222   : > { %v331_v28 = vsub.f32 1.0, %v330_v27 }
 0x224   : > { %v332_v30 = vmul.f32 %v576_v26, %v331_v28 }
 0x226   : > { %v333_v32 = vadd.f32 %v576_v26, %v332_v30 }
 0x228   : > { %v337_v34 = vsel %vm336_vm7, %v576_v26, %v333_v32 }
 0x229   : > { %v342_v35 = vsel %vm339_vm8, %v341_v33, %v337_v34 }
 0x22a   : > { %v343_v36 = vmul.f32 %v574_v23, %v342_v35 }
 0x22c   : > { %522 = vmatmul.msk.f32.vlgmr.msra.gmra.mxu2 %vm319_vm4, %v343_v36  ;;  %371 = vst.msk [vmem:[%s239_s9] sm:$0xff] %vm319_vm4, %v343_v36 }
 0x22d   : > { %604 = shalt.err (!%p601_p3)
}
 0x22e   : > { %530 = dma.vmem_to_hbm [thread:$0]  (%p741_p5), %s405_s14, 128, %s407_s15, %s378_s16  }
 0x22f   : > { %s388_s12 = scalar_lea.hbm %s840_s4, %s525_s10  ;;  %s232_s13 = scalar_lea.vmem [#allocation2], %s515_s8 }
 0x230   : > { %s390_s25 = sshll.u32 %s232_s13, 4  ;;  %s392_s26 = sshll.u32 %s388_s12, 4  ;;  %s391_s25 = int_to_ptr.vmem [resolvable:$true] %s390_s25  ;;  %s393_s26 = int_to_ptr.hbm [resolvable:$true] %s392_s26 }
 0x231   : > { %s373_s17 = scalar_lea.sflag [#allocation3], %s780_s7  ;;  %s619_s23 = sshra.s32 %s393_s26, 4  ;;  %s620_s23 = int_to_ptr.hbm [resolvable:$true] %s619_s23 }
 0x232   : > { %s621_s14 = scalar_lea.hbm %s620_s23, 8  ;;  %s625_s15 = scalar_lea.hbm %s840_s4, 16 }
 0x233   : > { %p622_p4 = scmp.ne.s32.totalorder %s620_s23, %s621_s14  ;;  %p626_p9 = scmp.lt.s32.totalorder %s620_s23, %s840_s4 }
 0x234   : > { %p627_p10 = scmp.lt.s32.totalorder %s625_s15, %s621_s14 }
 0x235   : > { %p623_p7 = pnand %p622_p4, %p741_p5 }
 0x236   : > { %p628_p11 = por %p627_p10, %p626_p9 }
 0x237   : > { %p624_p8 = pneg %p623_p7 }
 0x239   : > { %p629_p12 = pnand %p628_p11, %p624_p8 }
 0x2af   : > { %v364_v37 = vpop.f32.mrf.mxu2 }
 0x2b0   : > { %vm367_vm9 = vcmp.gt.f32.partialorder %v364_v37, 0.0  ;;  %v368_v38 = vmul.f32 0.01, %v364_v37 }
 0x2b2   : > { %v369_v39 = vsel %vm367_vm9, %v364_v37, %v368_v38 }
 0x2b3   : > { %370 = vst.msk [vmem:[%s232_s13] sm:$0xff] %vm280_vm1, %v369_v39 }
 0x2b4   : > { %632 = shalt.err (!%p629_p12)
}
 0x2b5   : > { %529 = dma.vmem_to_hbm [thread:$0]  (%p741_p5), %s391_s25, 128, %s393_s26, %s373_s17  }
 0x2b6 PF: > { %p540_p13 = scmp.ge.s32.totalorder %s671_s21, 2  ;;  %s418_s7 = sand.u32 1, %s659_s18  }
 0x2b7   : > { %s419_s30 = scalar_lea.sflag [#allocation3], %s418_s7 }
 0x2b8   : > { %p534_p0 = pnand %p540_p13, %p745_p6 }
 0x2ba   : > { %p535_p1 = pneg %p534_p0 }
 0x2bc   : > { %650 = dma.done.wait (%p535_p1), %s419_s30, 128  }
 0x2bd   : > { %652 = vsyncadd (%p535_p1), %s419_s30, 4294967168  ;;  %s429_s6 = scalar_lea.sflag [#allocation5], %s418_s7 }
 0x2be   : > { %654 = dma.done.wait (%p535_p1), %s429_s6, 128  }
 0x2bf   : > { %656 = vsyncadd (%p535_p1), %s429_s6, 4294967168  ;;  %p19_p5 = scmp.ge.s32.totalorder %s728_s24, 4   ;;  %s844_s18 = smov %s663_s19 }
 0x2c0   : > { %s845_s19 = smov %s667_s20  ;;  %s846_s20 = smov %s739_s27 }
 0x2c1   : > { %s847_s21 = smov %s728_s24  ;;  %21 = sbr.rel (!%p19_p5) target bundleno = 5 (0x5), region = 91 }
 0x2c6   :  { %435 = vsyncpa [#allocation3], 1 }
 0x2c7   :  { %437 = vsyncpa [#allocation3 + $0x1], 1 }
 0x2c8   :  { %438 = vsyncpa [#allocation5], 1 }
 0x2c9   :  { %440 = vsyncpa [#allocation5 + $0x1], 1 }

</bundles_post_ra>
